<compile_context>
chip_gen: v6e
topology: v6e:2x2x1
jax: 0.10.0
libtpu: 0.0.40
codegen_flags: <defaults>
</compile_context>

<pallas_src>
import functools

import jax
import jax.numpy as jnp
from jax import lax
from jax.experimental import pallas as pl
from jax.experimental.pallas import tpu as pltpu


def _round_up(x, m):
    return ((x + m - 1) // m) * m


def attention_kernel(hid_ref, enc_ref, w_hid_ref, w_enc_ref, b_ref, v_ref, out_ref,
                     *, src_len):
    # hid_ref  : (TB, H)     decoder hidden states for this batch tile
    # enc_ref  : (TB, Sp, H) encoder outputs (Sp % 8 == 0 -> reshape is free)
    # w_hid_ref: (H, H)      rows of W_attn acting on the hidden half of the concat
    # w_enc_ref: (H, H)      rows of W_attn acting on the encoder half of the concat
    # b_ref    : (1, H)      attn bias (f32)
    # v_ref    : (1, H)      v weight row vector (f32)
    # out_ref  : (TB, Sp)    softmax attention weights (src_len on the lane axis)
    TB, Sp, H = enc_ref.shape

    hid = hid_ref[...]                                    # (TB, H)
    # Sp is a multiple of 8, so merging (TB, Sp) on the sublane axis is a
    # no-copy relayout (each batch slab starts on a sublane-tile boundary).
    enc = enc_ref[...].reshape(TB * Sp, H)                # (TB*Sp, H) fills MXU M dim

    # Hidden projection once per batch row (not repeated Sp times); bias folded here.
    hid_proj = (
        jnp.dot(hid, w_hid_ref[...], preferred_element_type=jnp.float32)
        + b_ref[...]
    )                                                     # (TB, H) f32

    # Encoder projection: one big MXU matmul with M = TB*Sp.
    enc_proj = jnp.dot(enc, w_enc_ref[...], preferred_element_type=jnp.float32)

    # energy = tanh(W_enc@enc + W_hid@hid + b) == tanh(W_attn @ concat(hid, enc) + b)
    energy = jnp.tanh(enc_proj.reshape(TB, Sp, H) + hid_proj[:, None, :])  # (TB, Sp, H)

    # v-projection as VPU multiply + lane (XLU) reduce instead of an N=1 MXU matmul.
    scores = jnp.sum(energy * v_ref[...], axis=-1)        # (TB, Sp) f32

    # Mask padded source positions (src_len .. Sp-1) to -inf before the softmax.
    if src_len != Sp:
        col = lax.broadcasted_iota(jnp.int32, (TB, Sp), 1)
        scores = jnp.where(col < src_len, scores, -jnp.inf)

    # Numerically stable softmax over src_len (lane axis), in f32.
    m = jnp.max(scores, axis=-1, keepdims=True)           # (TB, 1)
    e = jnp.exp(scores - m)                               # (TB, Sp)
    denom = jnp.sum(e, axis=-1, keepdims=True)            # (TB, 1)
    inv = pl.reciprocal(denom, approx=True)               # EUP slot (free-ish)
    inv = inv * (2.0 - denom * inv)                       # one Newton step -> ~exact f32
    out_ref[...] = (e * inv).astype(out_ref.dtype)


def attention_forward(hidden, encoder_outputs, w_attn, b_attn, v_w,
                      *, tb=None, use_bf16=None):
    """hidden: (B, H) f32; encoder_outputs: (B, S, H) f32.
       w_attn: (2H, H) laid out so x @ w_attn == PyTorch Linear(2H, H) with
       concat order (hidden, encoder); b_attn: (H,); v_w: (H, 1).
       Returns softmax attention weights (B, S) f32."""
    B, H = hidden.shape
    _, S, _ = encoder_outputs.shape

    if use_bf16 is None:
        # bf16-on-MXU / bf16 enc stream only pays off when H is large; keeping the
        # demo (H=32) in f32 preserves reference-level numerics.
        use_bf16 = H >= 256

    # Pad src_len to a sublane multiple so the in-kernel reshapes are free and
    # the (Sp, H) trailing block dims satisfy the (8, 128) tiling rule.
    Sp = _round_up(S, 8)

    # ---- batch-tile selection (generation-aware VMEM / MXU-M / megacore) ----
    if tb is None:
        vmem_budget = 24 * 1024 * 1024       # working-set budget; fits v7x 64 MiB with headroom
        bytes_per_row = 4 * Sp * H * 4       # ~double-buffered enc tile + f32 enc_proj/energy temps
        tb_cap = max(8, (vmem_budget // max(bytes_per_row, 1)) // 8 * 8)
        tb_target = _round_up(max(pl.cdiv(512, Sp), 1), 8)   # tb*Sp >= ~512 MXU rows
        tb = min(tb_cap, tb_target)
        tb = min(tb, _round_up(B, 8))        # don't over-pad tiny batches
        if B > 8:
            tb = min(tb, _round_up(pl.cdiv(B, 2), 8))  # keep >=2 grid steps (v7x 2-TC sharding)
    tb = max(8, _round_up(tb, 8))            # sublane-aligned blocks

    Bp = _round_up(B, tb)
    num_tiles = Bp // tb

    mxu_dtype = jnp.bfloat16 if use_bf16 else hidden.dtype

    # Pad batch (and src_len) with zeros; padded rows/cols are sliced off / masked.
    if Bp != B:
        hidden = jnp.pad(hidden, ((0, Bp - B), (0, 0)))
    if Bp != B or Sp != S:
        encoder_outputs = jnp.pad(encoder_outputs, ((0, Bp - B), (0, Sp - S), (0, 0)))

    hidden = hidden.astype(mxu_dtype)
    encoder_outputs = encoder_outputs.astype(mxu_dtype)   # halves HBM bytes when bf16

    # Split the concat weight: first H rows act on hidden, last H rows on encoder.
    w_hid = w_attn[:H, :].astype(mxu_dtype)   # (H, H)
    w_enc = w_attn[H:, :].astype(mxu_dtype)   # (H, H)
    b2 = b_attn.reshape(1, H).astype(jnp.float32)
    v2 = v_w.reshape(1, H).astype(jnp.float32)

    out = pl.pallas_call(
        functools.partial(attention_kernel, src_len=S),
        out_shape=jax.ShapeDtypeStruct((Bp, Sp), jnp.float32),
        grid_spec=pltpu.PrefetchScalarGridSpec(
            num_scalar_prefetch=0,
            grid=(num_tiles,),
            in_specs=[
                pl.BlockSpec((tb, H), lambda i: (i, 0)),         # hidden tile
                pl.BlockSpec((tb, Sp, H), lambda i: (i, 0, 0)),  # encoder tile (dominant stream)
                pl.BlockSpec((H, H), lambda i: (0, 0)),          # W_hid (resident)
                pl.BlockSpec((H, H), lambda i: (0, 0)),          # W_enc (resident)
                pl.BlockSpec((1, H), lambda i: (0, 0)),          # bias
                pl.BlockSpec((1, H), lambda i: (0, 0)),          # v
            ],
            out_specs=pl.BlockSpec((tb, Sp), lambda i: (i, 0)),
        ),
        compiler_params=pltpu.CompilerParams(
            dimension_semantics=("parallel",),       # batch-tile axis shards across TCs
            vmem_limit_bytes=48 * 1024 * 1024,       # raise v5e/v6e 16/32 MiB default; < v7x 64 MiB
        ),
    )(hidden, encoder_outputs, w_hid, w_enc, b2, v2)

    return out[:B, :S]


def attention_reference(hidden, encoder_outputs, w_attn, b_attn, v_w):
    B, H = hidden.shape
    S = encoder_outputs.shape[1]
    hid_rep = jnp.broadcast_to(hidden[:, None, :], (B, S, H))
    cat = jnp.concatenate([hid_rep, encoder_outputs], axis=2)        # (B, S, 2H)
    energy = jnp.tanh(jnp.einsum("bsk,kh->bsh", cat, w_attn) + b_attn)
    scores = jnp.einsum("bsh,ho->bso", energy, v_w)[:, :, 0]         # (B, S)
    return jax.nn.softmax(scores, axis=1)


if __name__ == "__main__":
    B, S, H = 2, 8, 32
    key = jax.random.PRNGKey(0)
    k1, k2, k3, k4, k5 = jax.random.split(key, 5)

    # synthetic parameters (shapes from nn.Linear(2H, H), nn.Linear(H, 1, bias=False))
    w_attn = jax.random.normal(k1, (2 * H, H), jnp.float32) * 0.1
    b_attn = jax.random.normal(k2, (H,), jnp.float32) * 0.1
    v_w = jax.random.normal(k3, (H, 1), jnp.float32) * 0.1

    hidden = jax.random.normal(k4, (B, H), jnp.float32)
    encoder_outputs = jax.random.normal(k5, (B, S, H), jnp.float32)

    out = attention_forward(hidden, encoder_outputs, w_attn, b_attn, v_w)
    out = jax.block_until_ready(out)

    ref = attention_reference(hidden, encoder_outputs, w_attn, b_attn, v_w)
    assert out.shape == (B, S)
    assert jnp.allclose(out, ref, rtol=1e-4, atol=1e-5), "mismatch vs reference"
    assert jnp.allclose(jnp.sum(out, axis=1), jnp.ones((B,)), atol=1e-5)

    # Also exercise the src_len-padding / masking path (S not a multiple of 8).
    S2 = 10
    k6 = jax.random.fold_in(key, 6)
    enc2 = jax.random.normal(k6, (B, S2, H), jnp.float32)
    out2 = jax.block_until_ready(
        attention_forward(hidden, enc2, w_attn, b_attn, v_w))
    ref2 = attention_reference(hidden, enc2, w_attn, b_attn, v_w)
    assert out2.shape == (B, S2)
    assert jnp.allclose(out2, ref2, rtol=1e-4, atol=1e-5), "mismatch vs reference (padded S)"
    assert jnp.allclose(jnp.sum(out2, axis=1), jnp.ones((B,)), atol=1e-5)

    print("KERNEL_OK")
</pallas_src>

<mosaic_0001>
module attributes {stable_mosaic.version = 11 : i64} {
  func.func @attention_kernel(%arg0: i32, %arg1: memref<8x32xf32, #tpu.memory_space<vmem>>, %arg2: memref<8x8x32xf32, #tpu.memory_space<vmem>>, %arg3: memref<32x32xf32, #tpu.memory_space<vmem>>, %arg4: memref<32x32xf32, #tpu.memory_space<vmem>>, %arg5: memref<1x32xf32, #tpu.memory_space<vmem>>, %arg6: memref<1x32xf32, #tpu.memory_space<vmem>>, %arg7: memref<8x8xf32, #tpu.memory_space<vmem>>) attributes {dimension_semantics = [#tpu.dimension_semantics<parallel>], iteration_bounds = array<i64: 1>, scalar_prefetch = 0 : i64, scratch_operands = 0 : i64, tpu.core_type = #tpu.core_type<tc>, window_params = [{transform_indices = @transform_0, window_bounds = array<i64: 8, 32>}, {transform_indices = @transform_1, window_bounds = array<i64: 8, 8, 32>}, {pipeline_mode = #tpu.pipeline_mode<synchronous>, transform_indices = @transform_2, window_bounds = array<i64: 32, 32>}, {pipeline_mode = #tpu.pipeline_mode<synchronous>, transform_indices = @transform_3, window_bounds = array<i64: 32, 32>}, {pipeline_mode = #tpu.pipeline_mode<synchronous>, transform_indices = @transform_4, window_bounds = array<i64: 1, 32>}, {pipeline_mode = #tpu.pipeline_mode<synchronous>, transform_indices = @transform_5, window_bounds = array<i64: 1, 32>}, {transform_indices = @transform_6, window_bounds = array<i64: 8, 8>}]} {
    %c0 = arith.constant 0 : index
    %c0_0 = arith.constant 0 : index
    %0 = vector.load %arg1[%c0, %c0_0] : memref<8x32xf32, #tpu.memory_space<vmem>>, vector<8x32xf32>
    %c0_1 = arith.constant 0 : index
    %c0_2 = arith.constant 0 : index
    %c0_3 = arith.constant 0 : index
    %1 = vector.load %arg2[%c0_1, %c0_2, %c0_3] : memref<8x8x32xf32, #tpu.memory_space<vmem>>, vector<8x8x32xf32>
    %2 = vector.shape_cast %1 : vector<8x8x32xf32> to vector<64x32xf32>
    %c0_4 = arith.constant 0 : index
    %c0_5 = arith.constant 0 : index
    %3 = vector.load %arg3[%c0_4, %c0_5] : memref<32x32xf32, #tpu.memory_space<vmem>>, vector<32x32xf32>
    %cst = arith.constant dense<0.000000e+00> : vector<8x32xf32>
    %4 = tpu.matmul %0, %3, %cst {dimension_numbers = #tpu.dot_dimension_numbers<[1], [0], [0], [1], [0, 0, 1, 1], [], []>} : vector<8x32xf32>, vector<32x32xf32>, vector<8x32xf32> -> vector<8x32xf32>
    %c0_6 = arith.constant 0 : index
    %c0_7 = arith.constant 0 : index
    %5 = vector.load %arg5[%c0_6, %c0_7] : memref<1x32xf32, #tpu.memory_space<vmem>>, vector<1x32xf32>
    %6 = vector.broadcast %5 : vector<1x32xf32> to vector<8x32xf32>
    %7 = arith.addf %4, %6 : vector<8x32xf32>
    %c0_8 = arith.constant 0 : index
    %c0_9 = arith.constant 0 : index
    %8 = vector.load %arg4[%c0_8, %c0_9] : memref<32x32xf32, #tpu.memory_space<vmem>>, vector<32x32xf32>
    %cst_10 = arith.constant dense<0.000000e+00> : vector<64x32xf32>
    %9 = tpu.matmul %2, %8, %cst_10 {dimension_numbers = #tpu.dot_dimension_numbers<[1], [0], [0], [1], [0, 0, 1, 1], [], []>} : vector<64x32xf32>, vector<32x32xf32>, vector<64x32xf32> -> vector<64x32xf32>
    %10 = vector.shape_cast %9 : vector<64x32xf32> to vector<8x8x32xf32>
    %11 = vector.shape_cast %7 : vector<8x32xf32> to vector<8x1x32xf32>
    %12 = vector.broadcast %11 : vector<8x1x32xf32> to vector<8x8x32xf32>
    %13 = arith.addf %10, %12 : vector<8x8x32xf32>
    %14 = math.tanh %13 : vector<8x8x32xf32>
    %c0_11 = arith.constant 0 : index
    %c0_12 = arith.constant 0 : index
    %15 = vector.load %arg6[%c0_11, %c0_12] : memref<1x32xf32, #tpu.memory_space<vmem>>, vector<1x32xf32>
    %16 = vector.shape_cast %15 : vector<1x32xf32> to vector<1x1x32xf32>
    %17 = vector.broadcast %16 : vector<1x1x32xf32> to vector<8x8x32xf32>
    %18 = arith.mulf %14, %17 : vector<8x8x32xf32>
    %cst_13 = arith.constant dense<0.000000e+00> : vector<8x8xf32>
    %19 = vector.multi_reduction <add>, %18, %cst_13 [2] : vector<8x8x32xf32> to vector<8x8xf32>
    %cst_14 = arith.constant dense<0xFF800000> : vector<8xf32>
    %20 = vector.multi_reduction <maximumf>, %19, %cst_14 [1] : vector<8x8xf32> to vector<8xf32>
    %21 = vector.shape_cast %20 : vector<8xf32> to vector<8x1xf32>
    %22 = vector.broadcast %21 : vector<8x1xf32> to vector<8x8xf32>
    %23 = arith.subf %19, %22 : vector<8x8xf32>
    %24 = math.exp %23 : vector<8x8xf32>
    %cst_15 = arith.constant dense<0.000000e+00> : vector<8xf32>
    %25 = vector.multi_reduction <add>, %24, %cst_15 [1] : vector<8x8xf32> to vector<8xf32>
    %26 = vector.shape_cast %25 : vector<8xf32> to vector<8x1xf32>
    %27 = tpu.reciprocal %26 {approx = true} : vector<8x1xf32> -> vector<8x1xf32>
    %28 = arith.mulf %26, %27 : vector<8x1xf32>
    %cst_16 = arith.constant 2.000000e+00 : f32
    %29 = vector.broadcast %cst_16 : f32 to vector<8x1xf32>
    %30 = arith.subf %29, %28 : vector<8x1xf32>
    %31 = arith.mulf %27, %30 : vector<8x1xf32>
    %32 = vector.broadcast %31 : vector<8x1xf32> to vector<8x8xf32>
    %33 = arith.mulf %24, %32 : vector<8x8xf32>
    %c0_17 = arith.constant 0 : index
    %c0_18 = arith.constant 0 : index
    %34 = vector.load %arg7[%c0_17, %c0_18] : memref<8x8xf32, #tpu.memory_space<vmem>>, vector<8x8xf32>
    tpu.vector_store %arg7[%c0_17, %c0_18], %33 {strides = array<i32>} : memref<8x8xf32, #tpu.memory_space<vmem>>, vector<8x8xf32>,
    return
  }
  func.func @transform_0(%arg0: i32) -> (i32, i32) {
    %c0_i32 = arith.constant 0 : i32
    %c0_i32_0 = arith.constant 0 : i32
    return %arg0, %c0_i32 : i32, i32
  }
  func.func @transform_1(%arg0: i32) -> (i32, i32, i32) {
    %c0_i32 = arith.constant 0 : i32
    %c0_i32_0 = arith.constant 0 : i32
    %c0_i32_1 = arith.constant 0 : i32
    return %arg0, %c0_i32, %c0_i32_0 : i32, i32, i32
  }
  func.func @transform_2(%arg0: i32) -> (i32, i32) {
    %c0_i32 = arith.constant 0 : i32
    %c0_i32_0 = arith.constant 0 : i32
    %c0_i32_1 = arith.constant 0 : i32
    return %c0_i32, %c0_i32_0 : i32, i32
  }
  func.func @transform_3(%arg0: i32) -> (i32, i32) {
    %c0_i32 = arith.constant 0 : i32
    %c0_i32_0 = arith.constant 0 : i32
    %c0_i32_1 = arith.constant 0 : i32
    return %c0_i32, %c0_i32_0 : i32, i32
  }
  func.func @transform_4(%arg0: i32) -> (i32, i32) {
    %c0_i32 = arith.constant 0 : i32
    %c0_i32_0 = arith.constant 0 : i32
    %c0_i32_1 = arith.constant 0 : i32
    return %c0_i32, %c0_i32_0 : i32, i32
  }
  func.func @transform_5(%arg0: i32) -> (i32, i32) {
    %c0_i32 = arith.constant 0 : i32
    %c0_i32_0 = arith.constant 0 : i32
    %c0_i32_1 = arith.constant 0 : i32
    return %c0_i32, %c0_i32_0 : i32, i32
  }
  func.func @transform_6(%arg0: i32) -> (i32, i32) {
    %c0_i32 = arith.constant 0 : i32
    %c0_i32_0 = arith.constant 0 : i32
    return %arg0, %c0_i32 : i32, i32
  }
}

</mosaic_0001>

<bundles_post_ra>
// kernel: tpu_custom_call.1
= control target key start
LH: loop header
LB: loop body
LE: loop exit
PB: predicated region body
PF: predicated region fallthrough
CT: control target
= control target key end

     0   :  { %11 = vsyncpa [#allocation3], 0  ;;  %s1216_s0 = inlined_call_operand.hbm [shape: f32[8,32], index: 0, kind: input, shape index: {}]   ;;  %s1217_s1 = inlined_call_operand.hbm [shape: f32[8,8,32], index: 1, kind: input, shape index: {}]   ;;  %s1218_s2 = inlined_call_operand.hbm [shape: f32[32,32], index: 2, kind: input, shape index: {}]   ;;  %s1219_s3 = inlined_call_operand.hbm [shape: f32[32,32], index: 3, kind: input, shape index: {}]   ;;  %s1220_s4 = inlined_call_operand.vmem [shape: f32[1,32], index: 4, kind: input, shape index: {}]   ;;  %s1221_s5 = inlined_call_operand.vmem [shape: f32[1,32], index: 5, kind: input, shape index: {}]   ;;  %s1222_s6 = inlined_call_operand.hbm [shape: f32[8,8], index: 6, kind: output, shape index: {}]  }
   0x1   :  { %12 = vsyncpa [#allocation6], 0 }
   0x2   :  { %13 = vsyncpa [#allocation9], 0 }
   0x3   :  { %14 = vsyncpa [#allocation4], 0  ;;  %s1015_s21 = smov [#allocation5]  }
   0x4   :  { %s30_s22 = sshll.u32 %s1015_s21, 4  ;;  %s31_s22 = int_to_ptr.vmem [resolvable:$true] %s30_s22 }
   0x5   :  { %s915_s23 = scalar_lea.vmem %s31_s22, 1024  ;;  %p920_p1 = scmp.lt.s32.totalorder %s31_s22, %s31_s22 }
   0x6   :  { %p916_p0 = scmp.ne.s32.totalorder %s31_s22, %s915_s23  ;;  %p921_p2 = scmp.lt.s32.totalorder %s915_s23, %s915_s23 }
   0x8   :  { %p922_p3 = por %p921_p2, %p920_p1 }
   0xa   :  { %p923_p4 = pnand %p922_p3, %p916_p0 }
   0xc   :  { %926 = shalt.err (!%p923_p4)
}
   0xd   :  { %s1016_s24 = smov 128   ;;  %s1017_s25 = smov 8  }
   0xe   :  { %36 = dma.hbm_to_vmem [thread:$0]  %s1217_s1, 1024, %s31_s22, [#allocation6], %s1016_s24, %s1016_s24, %s1017_s25  }
   0xf   :  { %s1018_s28 = smov [#allocation2]   ;;  %s1019_s30 = smov [#allocation7]  }
  0x10   :  { %s21_s29 = sshll.u32 %s1018_s28, 4  ;;  %s42_s7 = sshll.u32 %s1019_s30, 4  ;;  %s22_s29 = int_to_ptr.vmem [resolvable:$true] %s21_s29  ;;  %s43_s7 = int_to_ptr.vmem [resolvable:$true] %s42_s7 }
  0x11   :  { %s935_s8 = scalar_lea.vmem %s22_s29, 128  ;;  %p940_p6 = scmp.lt.s32.totalorder %s22_s29, %s22_s29 }
  0x12   :  { %p936_p5 = scmp.ne.s32.totalorder %s22_s29, %s935_s8  ;;  %p941_p7 = scmp.lt.s32.totalorder %s935_s8, %s935_s8 }
  0x14   :  { %p942_p8 = por %p941_p7, %p940_p6 }
  0x16   :  { %p943_p9 = pnand %p942_p8, %p936_p5 }
  0x18   :  { %946 = shalt.err (!%p943_p9)
}
  0x19   :  { %24 = dma.hbm_to_vmem [thread:$0]  %s1216_s0, 128, %s22_s29, [#allocation3]  }
  0x1a   :  { %s955_s11 = scalar_lea.vmem %s43_s7, 512  ;;  %p960_p11 = scmp.lt.s32.totalorder %s43_s7, %s43_s7 }
  0x1b   :  { %p956_p10 = scmp.ne.s32.totalorder %s43_s7, %s955_s11  ;;  %p961_p12 = scmp.lt.s32.totalorder %s955_s11, %s955_s11 }
  0x1d   :  { %p962_p13 = por %p961_p12, %p960_p11 }
  0x1f   :  { %p963_p0 = pnand %p962_p13, %p956_p10 }
  0x21   :  { %966 = shalt.err (!%p963_p0)
}
  0x22   :  { %48 = dma.hbm_to_vmem [thread:$0]  %s1218_s2, 512, %s43_s7, [#allocation6], %s1016_s24, %s1016_s24, %s1017_s25  }
  0x23   :  { %s1020_s13 = smov [#allocation8]  }
  0x24   :  { %s54_s14 = sshll.u32 %s1020_s13, 4  ;;  %s55_s14 = int_to_ptr.vmem [resolvable:$true] %s54_s14 }
  0x25   :  { %s975_s15 = scalar_lea.vmem %s55_s14, 512  ;;  %p980_p2 = scmp.lt.s32.totalorder %s55_s14, %s55_s14 }
  0x26   :  { %p976_p1 = scmp.ne.s32.totalorder %s55_s14, %s975_s15  ;;  %p981_p3 = scmp.lt.s32.totalorder %s975_s15, %s975_s15 }
  0x28   :  { %p982_p4 = por %p981_p3, %p980_p2 }
  0x2a   :  { %p983_p5 = pnand %p982_p4, %p976_p1 }
  0x2c   :  { %986 = shalt.err (!%p983_p5)
}
  0x2d   :  { %60 = dma.hbm_to_vmem [thread:$0]  %s1219_s3, 512, %s55_s14, [#allocation9], %s1016_s24, %s1016_s24, %s1017_s25  }
  0x2e   :  { %1007 = dma.done.wait [#allocation3], 128  }
  0x2f   :  { %1008 = vsyncadd [#allocation3], 4294967168 }
  0x30   :  { %1009 = dma.done.wait [#allocation6], 1536  }
  0x31   :  { %1010 = vsyncadd [#allocation6], 4294965760 }
  0x32   :  { %1011 = dma.done.wait [#allocation9], 512  }
  0x33   :  { %1012 = vsyncadd [#allocation9], 4294966784  ;;  %v1021_v0 = vmov 0.0   ;;  %vm1022_vm0 = vmmov 0   ;;  %v89_v1 = vld [vmem:[#allocation7 + $0x18] sm:$0xff]  ;;  %v88_v2 = vld [vmem:[#allocation7 + $0x10] sm:$0xff]  ;;  %v309_v20 = vlaneseq }
  0x34   :  { %821 = vmatprep.subr.mxu0 %v1021_v0  ;;  %829 = vmatprep.mubr.msk.f32.mxu0 %vm1022_vm0, %v1021_v0  ;;  %v174_v3 = vld [vmem:[#allocation8 + $0x18] sm:$0xff]  ;;  %v173_v4 = vld [vmem:[#allocation8 + $0x10] sm:$0xff]  ;;  %v87_v5 = vld [vmem:[#allocation7 + $0x8] sm:$0xff]  ;;  %vm97_vm1 = vcmask 261120   ;;  %v1023_v18 = vmov 1966171168  }
  0x35   :  { %822 = vmatpush3.msra.mxu0 %v89_v1  ;;  %852 = vmatprep.subr.mxu1 %v174_v3  ;;  %v172_v6 = vld [vmem:[#allocation8 + $0x8] sm:$0xff]  ;;  %v86_v7 = vld [vmem:[#allocation7] sm:$0xff]  ;;  %v77_v9 = vld [vmem:[#allocation2] sm:$0xff]  ;;  %v307_v19 = vunpack.c.l.s4 %v1023_v18  ;;  %v1092_v22 = vshrl.u32 %v309_v20, 7  ;;  %vm491_vm2 = vcmask 1041409   ;;  %vm493_vm3 = vcmask 1042434  }
  0x36   :  { %823 = vmatprep.subr.mxu0 %v1021_v0  ;;  %856 = vmatpush3.msra.mxu1 %v174_v3  ;;  %v171_v8 = vld [vmem:[#allocation8] sm:$0xff]  ;;  %v80_v10 = vld [vmem:[#allocation5 + $0x10] sm:$0xff]  ;;  %v81_v11 = vld [vmem:[#allocation5 + $0x18] sm:$0xff]  ;;  %vm495_vm4 = vcmask 1043459   ;;  %vm497_vm5 = vcmask 1044484   ;;  %vm499_vm6 = vcmask 1045509  }
  0x37   :  { %824 = vmatpush3.msra.mxu0 %v88_v2  ;;  %853 = vmatprep.subr.mxu1 %v173_v4  ;;  %v82_v12 = vld [vmem:[#allocation5 + $0x20] sm:$0xff]  ;;  %v83_v14 = vld [vmem:[#allocation5 + $0x28] sm:$0xff]  ;;  %v84_v16 = vld [vmem:[#allocation5 + $0x30] sm:$0xff]  ;;  %v308_v21 = vunpack.c.0.s8 %v307_v19  ;;  %v1099_v34 = vsub.s32 0, %v1092_v22  ;;  %vm501_vm7 = vcmask 1046534   ;;  %vm503_vm8 = vcmask 1047559  }
  0x38   :  { %825 = vmatprep.subr.mxu0 %v1021_v0  ;;  %857 = vmatpush3.msra.mxu1 %v173_v4  ;;  %v78_v13 = vld [vmem:[#allocation5] sm:$0xff]  ;;  %v79_v15 = vld [vmem:[#allocation5 + $0x8] sm:$0xff]  ;;  %v85_v17 = vld [vmem:[#allocation5 + $0x38] sm:$0xff]  ;;  %vm506_vm9 = vcmask 64512  }
  0x39   :  { %826 = vmatpush3.msra.mxu0 %v87_v5  ;;  %854 = vmatprep.subr.mxu1 %v172_v6  ;;  %v793_v23 = vld [vmem:[%s1220_s4] ss:$0 sm:$0xff]  ;;  %v311_v24 = vsub.s32 %v308_v21, %v1092_v22 }
  0x3a   :  { %827 = vmatprep.subr.mxu0 %v1021_v0  ;;  %858 = vmatpush3.msra.mxu1 %v172_v6  ;;  %v803_v2 = vld [vmem:[%s1221_s5] ss:$0 sm:$0xff]  ;;  %s1025_s5 = smov [#allocation10]  }
  0x3b   :  { %828 = vmatpush3.msra.mxu0 %v86_v7  ;;  %855 = vmatprep.subr.mxu1 %v171_v8  ;;  %s782_s18 = sshll.u32 %s1025_s5, 4  ;;  %s783_s18 = int_to_ptr.vmem [resolvable:$true] %s782_s18 }
  0x3c   :  { %830 = vmatmul.mubr.msk.f32.vlgmr.msra.gmra.mxu0 %vm97_vm1, %v77_v9  ;;  %832 = vmatprep.subr.mxu0 %v174_v3  ;;  %s987_s19 = scalar_lea.vmem %s783_s18, 128  ;;  %p992_p7 = scmp.lt.s32.totalorder %s783_s18, %s783_s18 }
  0x3d   :  { %833 = vmatpush3.msra.mxu0 %v174_v3  ;;  %859 = vmatpush3.msra.mxu1 %v171_v8  ;;  %p988_p6 = scmp.ne.s32.totalorder %s783_s18, %s987_s19  ;;  %p993_p8 = scmp.lt.s32.totalorder %s987_s19, %s987_s19 }
  0x3e   :  { %834 = vmatprep.subr.mxu0 %v173_v4  ;;  %843 = vmatprep.mubr.msk.f32.mxu1 %vm97_vm1, %v80_v10 }
  0x3f   :  { %835 = vmatpush3.msra.mxu0 %v173_v4  ;;  %844 = vmatmul.mubr.msk.f32.vlgmr.msra.gmra.mxu1 %vm97_vm1, %v81_v11  ;;  %p994_p9 = por %p993_p8, %p992_p7 }
  0x40   :  { %836 = vmatprep.subr.mxu0 %v172_v6  ;;  %846 = vmatprep.mubr.msk.f32.mxu1 %vm97_vm1, %v82_v12 }
  0x41   :  { %837 = vmatpush3.msra.mxu0 %v172_v6  ;;  %840 = vmatprep.mubr.msk.f32.mxu0 %vm97_vm1, %v78_v13  ;;  %p995_p10 = pnand %p994_p9, %p988_p6 }
  0x42   :  { %838 = vmatprep.subr.mxu0 %v171_v8 }
  0x43   :  { %839 = vmatpush3.msra.mxu0 %v171_v8  ;;  %847 = vmatmul.mubr.msk.f32.gmra.mxu1 %vm97_vm1, %v83_v14 }
  0x44   :  { %841 = vmatmul.mubr.msk.f32.vlgmr.msra.gmra.mxu0 %vm97_vm1, %v79_v15  ;;  %849 = vmatprep.mubr.msk.f32.mxu1 %vm97_vm1, %v84_v16 }
  0x47   :  { %850 = vmatmul.mubr.msk.f32.gmra.mxu1 %vm97_vm1, %v85_v17 }
  0xfc   :  { %v167_v25 = vpop.f32.mrf.mxu0 }
  0xfd   :  { %v168_v26 = vadd.f32 %v793_v23, %v167_v25 }
  0xfe   :  { %v831_v27 = vpop.f32.mrf.mxu0 }
  0xff   :  { %v305_v28 = vcombine.high %v168_v26, %v168_v26  ;;  %v312_v29 = vrot.slane %v168_v26, %v311_v24  ;;  %v845_v30 = vpop.f32.mrf.mxu1 }
 0x101   :  { %v319_v31 = vrot.slane %v305_v28, %v311_v24  ;;  %v320_v32 = vcombine.high %v312_v29, %v312_v29  ;;  %v328_v33 = vrot.slane %v312_v29, %v311_v24  ;;  %v275_v35 = vpop.f32.mrf.mxu1 }
 0x103   :  { %v342_v36 = vrot.slane %v320_v32, %v311_v24  ;;  %v350_v37 = vcombine.high %v328_v33, %v328_v33  ;;  %v848_v38 = vpop.f32.mrf.mxu1  ;;  %v321_v39 = vcombine.high %v319_v31, %v319_v31  ;;  %v335_v45 = vrot.slane %v319_v31, %v311_v24 }
 0x104   :  { %v842_v40 = vpop.f32.mrf.mxu0  ;;  %v357_v46 = vrot.slane %v328_v33, %v1099_v34 }
 0x105   :  { %v352_v41 = vcombine.high %v342_v36, %v342_v36  ;;  %v365_v42 = vrot.slane %v350_v37, %v1099_v34  ;;  %v349_v43 = vrot.slane %v321_v39, %v311_v24  ;;  %v361_v44 = vrot.slane %v342_v36, %v1099_v34  ;;  %v285_v50 = vpop.f32.mrf.mxu1 }
 0x106   :  { %v265_v51 = vpop.f32.mrf.mxu0  ;;  %v373_v56 = vrot.slane %v335_v45, %v1099_v34  ;;  %v351_v59 = vcombine.high %v335_v45, %v335_v45 }
 0x107   :  { %v369_v47 = vrot.slane %v352_v41, %v1099_v34  ;;  %v396_v48 = vadd.f32 %v365_v42, %v275_v35  ;;  %v377_v49 = vrot.slane %v349_v43, %v1099_v34  ;;  %v395_v52 = vadd.f32 %v842_v40, %v361_v44  ;;  %v851_v60 = vpop.f32.mrf.mxu1 }
 0x108   :  { %v353_v53 = vcombine.high %v349_v43, %v349_v43  ;;  %v394_v57 = vadd.f32 %v357_v46, %v265_v51  ;;  %v398_v62 = vadd.f32 %v373_v56, %v285_v50  ;;  %v381_v63 = vrot.slane %v351_v59, %v1099_v34 }
 0x109   :  { %v397_v54 = vadd.f32 %v845_v30, %v369_v47  ;;  %873 = vtanh.f32 %v396_v48  ;;  %v399_v55 = vadd.f32 %v848_v38, %v377_v49  ;;  %v295_v0 = vpop.f32.mrf.mxu1  ;;  %v458_v30 = vand.u32 127, %v309_v20 }
 0x10a   :  { %v385_v58 = vrot.slane %v353_v53, %v1099_v34  ;;  %v400_v1 = vadd.f32 %v381_v63, %v295_v0  ;;  %v517_v56 = vsub.s32 1, %v1092_v22  ;;  %v529_v63 = vsub.s32 4, %v1092_v22 }
 0x10b   :  { %875 = vtanh.f32 %v397_v54  ;;  %v1122_v33 = vsub.s32 %v458_v30, %v1092_v22 }
 0x10c   :  { %877 = vtanh.f32 %v395_v52  ;;  %v401_v61 = vadd.f32 %v851_v60, %v385_v58  ;;  %v525_v58 = vsub.s32 3, %v1092_v22 }
 0x10d   :  { %879 = vtanh.f32 %v399_v55  ;;  %v1024_v55 = vmov 0  }
 0x10e   :  { %881 = vtanh.f32 %v394_v57  ;;  %872 = vset.pattern.permute.xlu0 %v1024_v55  ;;  %871 = vset.pattern.permute.xlu1 %v1024_v55  ;;  %v521_v57 = vsub.s32 2, %v1092_v22 }
 0x10f   :  { %883 = vtanh.f32 %v401_v61 }
 0x110   :  { %885 = vtanh.f32 %v398_v62 }
 0x111   :  { %887 = vtanh.f32 %v400_v1 }
 0x116   :  { %v874_v3 = vpop.eup %873 }
 0x117   :  { %v419_v4 = vmul.f32 %v874_v3, %v803_v2 }
 0x118   :  { %v876_v5 = vpop.eup %875 }
 0x119   :  { %v878_v6 = vpop.eup %877  ;;  %v431_v7 = vsel %vm97_vm1, %v419_v4, 0.0  ;;  %v420_v8 = vmul.f32 %v876_v5, %v803_v2 }
 0x11a   :  { %v880_v9 = vpop.eup %879  ;;  %432 = vadd.xlane.f32.xlu1 %v431_v7  ;;  %v418_v16 = vmul.f32 %v878_v6, %v803_v2  ;;  %v533_v6 = vsub.s32 5, %v1092_v22 }
 0x11b   :  { %v882_v10 = vpop.eup %881  ;;  %v434_v12 = vsel %vm97_vm1, %v420_v8, 0.0  ;;  %v422_v13 = vmul.f32 %v880_v9, %v803_v2 }
 0x11c   :  { %v417_v11 = vmul.f32 %v882_v10, %v803_v2  ;;  %v884_v14 = vpop.eup %883  ;;  %v428_v21 = vsel %vm97_vm1, %v418_v16, 0.0  ;;  %v537_v10 = vsub.s32 6, %v1092_v22 }
 0x11d   :  { %v886_v17 = vpop.eup %885  ;;  %v440_v18 = vsel %vm97_vm1, %v422_v13, 0.0  ;;  %v424_v19 = vmul.f32 %v884_v14, %v803_v2  ;;  %v541_v14 = vsub.s32 7, %v1092_v22 }
 0x11e   :  { %v425_v15 = vsel %vm97_vm1, %v417_v11, 0.0  ;;  %435 = vadd.xlane.f32.xlu1 %v434_v12  ;;  %v421_v23 = vmul.f32 %v886_v17, %v803_v2  ;;  %v888_v24 = vpop.eup %887 }
 0x11f   :  { %426 = vadd.xlane.f32.xlu0 %v425_v15  ;;  %v446_v25 = vsel %vm97_vm1, %v424_v19, 0.0  ;;  %v423_v27 = vmul.f32 %v888_v24, %v803_v2 }
 0x120   :  { %v437_v26 = vsel %vm97_vm1, %v421_v23, 0.0 }
 0x121   :  { %v443_v28 = vsel %vm97_vm1, %v423_v27, 0.0 }
 0x122   :  { %441 = vadd.xlane.f32.xlu1 %v440_v18 }
 0x123   :  { %429 = vadd.xlane.f32.xlu0 %v428_v21 }
 0x126   :  { %447 = vadd.xlane.f32.xlu1 %v446_v25 }
 0x127   :  { %438 = vadd.xlane.f32.xlu0 %v437_v26 }
 0x12b   :  { %444 = vadd.xlane.f32.xlu0 %v443_v28 }
 0x1a3   :  { %v433_v29 = vpop.xlane.xlu1 %432 }
 0x1a4   :  { %v470_v39 = vrot.slane %v433_v29, %v1122_v33 }
 0x1a7   :  { %v436_v31 = vpop.xlane.xlu1 %435 }
 0x1a8   :  { %v427_v32 = vpop.xlane.xlu0 %426  ;;  %v474_v40 = vrot.slane %v436_v31, %v1122_v33 }
 0x1a9   :  { %v462_v37 = vrot.slane %v427_v32, %v1122_v33 }
 0x1ab   :  { %v1124_v35 = vpop.xlane.xlu1 %441 }
 0x1ac   :  { %v430_v36 = vpop.xlane.xlu0 %429  ;;  %v482_v46 = vrot.slane %v1124_v35, %v1122_v33 }
 0x1ad   :  { %v466_v38 = vrot.slane %v430_v36, %v1122_v33 }
 0x1af   :  { %v492_v20 = vsel %vm491_vm2, %v466_v38, %v462_v37  ;;  %v448_v45 = vpop.xlane.xlu1 %447 }
 0x1b0   :  { %v494_v41 = vsel %vm493_vm3, %v470_v39, %v492_v20  ;;  %v439_v42 = vpop.xlane.xlu0 %438  ;;  %v490_v48 = vrot.slane %v448_v45, %v1122_v33 }
 0x1b1   :  { %v496_v43 = vsel %vm495_vm4, %v474_v40, %v494_v41  ;;  %v478_v44 = vrot.slane %v439_v42, %v1122_v33 }
 0x1b3   :  { %v498_v47 = vsel %vm497_vm5, %v478_v44, %v496_v43 }
 0x1b4   :  { %v445_v49 = vpop.xlane.xlu0 %444  ;;  %v500_v51 = vsel %vm499_vm6, %v482_v46, %v498_v47 }
 0x1b5   :  { %v486_v50 = vrot.slane %v445_v49, %v1122_v33 }
 0x1b7   :  { %v502_v52 = vsel %vm501_vm7, %v486_v50, %v500_v51 }
 0x1b8   :  { %v504_v53 = vsel %vm503_vm8, %v490_v48, %v502_v52 }
 0x1b9   :  { %v507_v54 = vsel %vm506_vm9, %v504_v53, -inf }
 0x1ba   :  { %508 = vmax.xlane.f32.xlu0 %v507_v54 }
 0x243   :  { %v509_v59 = vpop.xlane.xlu0 %508 }
 0x244   :  { %v514_v60 = vrot.slane %v509_v59, %v1099_v34  ;;  %v518_v61 = vrot.slane %v509_v59, %v517_v56  ;;  %v522_v62 = vrot.slane %v509_v59, %v521_v57  ;;  %v526_v0 = vrot.slane %v509_v59, %v525_v58 }
 0x245   :  { %v530_v7 = vrot.slane %v509_v59, %v529_v63  ;;  %v534_v11 = vrot.slane %v509_v59, %v533_v6  ;;  %v538_v15 = vrot.slane %v509_v59, %v537_v10  ;;  %v542_v18 = vrot.slane %v509_v59, %v541_v14 }
 0x246   :  { %v551_v1 = vsub.f32 %v427_v32, %v514_v60  ;;  %v552_v2 = vsub.f32 %v430_v36, %v518_v61  ;;  %v553_v3 = vsub.f32 %v433_v29, %v522_v62  ;;  %v554_v8 = vsub.f32 %v436_v31, %v526_v0 }
 0x247   :  { %v555_v12 = vsub.f32 %v439_v42, %v530_v7  ;;  %v556_v16 = vsub.f32 %v1124_v35, %v534_v11  ;;  %v557_v19 = vsub.f32 %v445_v49, %v538_v15  ;;  %v558_v25 = vsub.f32 %v448_v45, %v542_v18 }
 0x248   :  { %v559_v4 = vmul.f32 1.442695, %v551_v1  ;;  %v561_v5 = vmul.f32 1.442695, %v552_v2  ;;  %v563_v9 = vmul.f32 1.442695, %v553_v3 }
 0x249   :  { %v565_v13 = vmul.f32 1.442695, %v554_v8  ;;  %v567_v17 = vmul.f32 1.442695, %v555_v12  ;;  %v569_v21 = vmul.f32 1.442695, %v556_v16 }
 0x24a   :  { %889 = vpow2.f32 %v559_v4  ;;  %v571_v26 = vmul.f32 1.442695, %v557_v19  ;;  %v573_v28 = vmul.f32 1.442695, %v558_v25 }
 0x24b   :  { %891 = vpow2.f32 %v561_v5 }
 0x24c   :  { %893 = vpow2.f32 %v563_v9 }
 0x24d   :  { %895 = vpow2.f32 %v565_v13 }
 0x24e   :  { %897 = vpow2.f32 %v567_v17 }
 0x24f   :  { %899 = vpow2.f32 %v569_v21 }
 0x250   :  { %901 = vpow2.f32 %v571_v26 }
 0x251   :  { %903 = vpow2.f32 %v573_v28 }
 0x257   :  { %v890_v23 = vpop.eup %889 }
 0x258   :  { %v892_v24 = vpop.eup %891  ;;  %584 = vperm.xlu1 %871, %v890_v23  }
 0x259   :  { %587 = vperm.xlu0 %872, %v892_v24   ;;  %v894_v27 = vpop.eup %893 }
 0x25a   :  { %v896_v29 = vpop.eup %895 }
 0x25b   :  { %v898_v30 = vpop.eup %897 }
 0x25c   :  { %590 = vperm.xlu1 %871, %v894_v27   ;;  %v900_v31 = vpop.eup %899 }
 0x25d   :  { %v902_v32 = vpop.eup %901 }
 0x25e   :  { %v904_v35 = vpop.eup %903 }
 0x260   :  { %593 = vperm.xlu1 %871, %v896_v29  }
 0x264   :  { %596 = vperm.xlu1 %871, %v898_v30  }
 0x268   :  { %599 = vperm.xlu1 %871, %v900_v31  }
 0x26c   :  { %602 = vperm.xlu1 %871, %v902_v32  }
 0x270   :  { %605 = vperm.xlu1 %871, %v904_v35  }
 0x2d3   :  { %v585_v36 = vpop.permute.xlu1 %584 }
 0x2d4   :  { %v588_v40 = vpop.permute.xlu0 %587  ;;  %v610_v42 = vrot.slane %v585_v36, %v1122_v33 }
 0x2d5   :  { %v614_v41 = vrot.slane %v588_v40, %v1122_v33 }
 0x2d7   :  { %v591_v37 = vpop.permute.xlu1 %590  ;;  %v639_v47 = vsel %vm491_vm2, %v614_v41, %v610_v42 }
 0x2d8   :  { %v618_v43 = vrot.slane %v591_v37, %v1122_v33 }
 0x2da   :  { %v640_v49 = vsel %vm493_vm3, %v618_v43, %v639_v47 }
 0x2db   :  { %v594_v38 = vpop.permute.xlu1 %593 }
 0x2dc   :  { %v622_v44 = vrot.slane %v594_v38, %v1122_v33 }
 0x2de   :  { %v641_v51 = vsel %vm495_vm4, %v622_v44, %v640_v49 }
 0x2df   :  { %v597_v39 = vpop.permute.xlu1 %596 }
 0x2e0   :  { %v626_v45 = vrot.slane %v597_v39, %v1122_v33 }
 0x2e2   :  { %v642_v52 = vsel %vm497_vm5, %v626_v45, %v641_v51 }
 0x2e3   :  { %v600_v20 = vpop.permute.xlu1 %599 }
 0x2e4   :  { %v630_v48 = vrot.slane %v600_v20, %v1122_v33 }
 0x2e6   :  { %v643_v54 = vsel %vm499_vm6, %v630_v48, %v642_v52 }
 0x2e7   :  { %v603_v46 = vpop.permute.xlu1 %602 }
 0x2e8   :  { %v634_v50 = vrot.slane %v603_v46, %v1122_v33 }
 0x2ea   :  { %v644_v59 = vsel %vm501_vm7, %v634_v50, %v643_v54 }
 0x2eb   :  { %v606_v53 = vpop.permute.xlu1 %605 }
 0x2ec   :  { %v638_v55 = vrot.slane %v606_v53, %v1122_v33 }
 0x2ee   :  { %v645_v60 = vsel %vm503_vm8, %v638_v55, %v644_v59 }
 0x2ef   :  { %v647_v61 = vsel %vm506_vm9, %v645_v60, 0.0 }
 0x2f0   :  { %648 = vadd.xlane.f32.xlu1 %v647_v61 }
 0x379   :  { %v649_v62 = vpop.xlane.xlu1 %648 }
 0x37a   :  { %905 = vrcp.f32 %v649_v62 }
 0x387   :  { %v906_v0 = vpop.eup %905 }
 0x388   :  { %v651_v1 = vmul.f32 %v906_v0, %v649_v62 }
 0x38a   :  { %v652_v2 = vsub.f32 2.0, %v651_v1 }
 0x38c   :  { %v653_v3 = vmul.f32 %v906_v0, %v652_v2 }
 0x38e   :  { %v658_v4 = vrot.slane %v653_v3, %v1099_v34  ;;  %v662_v7 = vrot.slane %v653_v3, %v517_v56  ;;  %v666_v9 = vrot.slane %v653_v3, %v521_v57  ;;  %v670_v12 = vrot.slane %v653_v3, %v525_v58 }
 0x38f   :  { %v674_v15 = vrot.slane %v653_v3, %v529_v63  ;;  %v678_v56 = vrot.slane %v653_v3, %v533_v6  ;;  %v682_v57 = vrot.slane %v653_v3, %v537_v10  ;;  %v686_v58 = vrot.slane %v653_v3, %v541_v14 }
 0x390   :  { %v695_v5 = vmul.f32 %v890_v23, %v658_v4  ;;  %v696_v8 = vmul.f32 %v892_v24, %v662_v7  ;;  %v697_v11 = vmul.f32 %v894_v27, %v666_v9  ;;  %v698_v13 = vmul.f32 %v896_v29, %v670_v12 }
 0x391   :  { %v699_v34 = vmul.f32 %v898_v30, %v674_v15  ;;  %v700_v16 = vmul.f32 %v900_v31, %v678_v56  ;;  %v701_v17 = vmul.f32 %v902_v32, %v682_v57  ;;  %v702_v18 = vmul.f32 %v904_v35, %v686_v58 }
 0x392   :  { %712 = vperm.xlu0 %872, %v695_v5  }
 0x396   :  { %715 = vperm.xlu0 %872, %v696_v8  }
 0x39a   :  { %718 = vperm.xlu0 %872, %v697_v11  }
 0x39e   :  { %721 = vperm.xlu0 %872, %v698_v13  }
 0x3a2   :  { %724 = vperm.xlu0 %872, %v699_v34  }
 0x3a6   :  { %727 = vperm.xlu0 %872, %v700_v16  }
 0x3aa   :  { %730 = vperm.xlu0 %872, %v701_v17  }
 0x3ae   :  { %733 = vperm.xlu0 %872, %v702_v18  }
 0x40d   :  { %v713_v19 = vpop.permute.xlu0 %712 }
 0x40e   :  { %v738_v10 = vrot.slane %v713_v19, %v1122_v33 }
 0x411   :  { %v716_v63 = vpop.permute.xlu0 %715 }
 0x412   :  { %v742_v6 = vrot.slane %v716_v63, %v1122_v33 }
 0x414   :  { %v767_v28 = vsel %vm491_vm2, %v742_v6, %v738_v10 }
 0x415   :  { %v719_v21 = vpop.permute.xlu0 %718 }
 0x416   :  { %v746_v26 = vrot.slane %v719_v21, %v1122_v33 }
 0x418   :  { %v768_v30 = vsel %vm493_vm3, %v746_v26, %v767_v28 }
 0x419   :  { %v722_v23 = vpop.permute.xlu0 %721 }
 0x41a   :  { %v750_v27 = vrot.slane %v722_v23, %v1122_v33 }
 0x41c   :  { %v769_v32 = vsel %vm495_vm4, %v750_v27, %v768_v30 }
 0x41d   :  { %v725_v24 = vpop.permute.xlu0 %724 }
 0x41e   :  { %v754_v22 = vrot.slane %v725_v24, %v1122_v33 }
 0x420   :  { %v770_v35 = vsel %vm497_vm5, %v754_v22, %v769_v32 }
 0x421   :  { %v728_v25 = vpop.permute.xlu0 %727 }
 0x422   :  { %v758_v29 = vrot.slane %v728_v25, %v1122_v33 }
 0x424   :  { %v771_v37 = vsel %vm499_vm6, %v758_v29, %v770_v35 }
 0x425   :  { %v731_v14 = vpop.permute.xlu0 %730 }
 0x426   :  { %v762_v31 = vrot.slane %v731_v14, %v1122_v33 }
 0x428   :  { %v772_v39 = vsel %vm501_vm7, %v762_v31, %v771_v37 }
 0x429   :  { %v734_v36 = vpop.permute.xlu0 %733 }
 0x42a   :  { %v766_v38 = vrot.slane %v734_v36, %v1122_v33 }
 0x42c   :  { %v773_v40 = vsel %vm503_vm8, %v766_v38, %v772_v39 }
 0x42d   :  { %775 = vst.msk [vmem:[#allocation10] sm:$0xff] %vm506_vm9, %v773_v40 }
 0x42e   :  { %998 = shalt.err (!%p995_p10)
}
 0x42f   :  { %785 = dma.vmem_to_hbm [thread:$0]  %s783_s18, 128, %s1222_s6, [#allocation4]  }
 0x430   :  { %1013 = dma.done.wait [#allocation4], 128  }
 0x431   :  { %1014 = vsyncadd [#allocation4], 4294967168 }
 0x432   :  { %789 = vsyncpa [#allocation3], 1 }
 0x433   :  { %790 = vsyncpa [#allocation6], 1 }
 0x434   :  { %791 = vsyncpa [#allocation9], 1 }
 0x435   :  { %792 = vsyncpa [#allocation4], 1 }

</bundles_post_ra>
